<compile_context>
chip_gen: v5e
topology: v5e:2x2
jax: 0.10.0
libtpu: 0.0.40
codegen_flags: <defaults>
</compile_context>

<pallas_src>
from typing import Any, NamedTuple

import jax
import jax.numpy as jnp
from jax.experimental import pallas as pl
from jax.experimental.pallas import tpu as pltpu


# ----------------------------------------------------------------------------
# Helpers
# ----------------------------------------------------------------------------

def _round_up(x, m):
    return (x + m - 1) // m * m


def _cdiv(a, b):
    return (a + b - 1) // b


_TM_CAP = 1024               # max rows per M tile (whole batch when B <= 1024)
_FAST_PATH_MAX_ELEMS = 1 << 19   # whole problem trivially fits VMEM below this


def _vmem_capacity_bytes():
    """Per-TensorCore VMEM capacity; falls back to the smallest (v7x, 64 MiB)."""
    try:
        info = pltpu.get_tpu_info()
        cap = getattr(info, "vmem_capacity_bytes", None)
        if cap:
            return int(cap)
    except Exception:
        pass
    return 64 << 20


def _select_tiles(in_dim, out_dim, *, in_itemsize, out_itemsize, vmem_cap, tm):
    """Pick tk/tn (and possibly shrink tm) sized against this chip's VMEM.

    The double-buffered weight stream (2 * tk * tn) dominates, so we grow the
    tiles until the whole double-buffered working set approaches ~80% of the
    chip's VMEM:  ~51 MiB budget on v7x (64 MiB physical), ~102 MiB on
    v5e/v6e (128 MiB physical).
    """
    vmem_budget = int(min(int(vmem_cap * 0.80), 110 << 20))

    # K: whole reduction in one step when it fits; deeper K only on big-VMEM
    # parts where the weight tile stays within budget.
    tk_cap = 4096 if vmem_budget >= (96 << 20) else 2048
    tk = min(_round_up(in_dim, 128), tk_cap)

    # N: as large as the budget allows (lane-dense, multiples of 128), but keep
    # >= 2 N tiles when the head is wide enough so the two v7x TensorCores both
    # get a "parallel" tile. On single-TC chips this only adds one cheap step.
    np_min = _round_up(out_dim, 128)
    tn = min(np_min, 4096)
    if np_min >= 256:
        tn = min(tn, _round_up(_cdiv(np_min, 2), 128))

    def footprint(tm_, tk_, tn_):
        return (2 * tm_ * tk_ * in_itemsize      # x (double buffered)
                + 2 * tk_ * tn_ * in_itemsize    # weight (double buffered)
                + 2 * tn_ * 4                    # bias (f32)
                + 2 * tm_ * tn_ * out_itemsize   # output (double buffered)
                + tm_ * tn_ * 4)                 # f32 accumulator scratch

    # Shrink tn, then tk, then tm until the working set fits the budget.
    while footprint(tm, tk, tn) > vmem_budget and tn > 128:
        tn = _round_up(_cdiv(tn, 2), 128)
    while footprint(tm, tk, tn) > vmem_budget and tk > 128:
        tk = _round_up(_cdiv(tk, 2), 128)
    while footprint(tm, tk, tn) > vmem_budget and tm > 16:
        tm = _round_up(_cdiv(tm, 2), 16)

    vmem_limit = int(min(max(footprint(tm, tk, tn) + (4 << 20), 32 << 20),
                         int(vmem_cap * 0.9)))
    return tm, tk, tn, vmem_limit


def _pick_tm(batch, tm_cap):
    """Whole batch in one M tile when it fits; otherwise balanced M tiles
    (each extra M tile re-streams the full weight from HBM once)."""
    if batch <= tm_cap:
        return _round_up(batch, 16)
    n_m = _cdiv(batch, tm_cap)
    return _round_up(_cdiv(batch, n_m), 16)


# ----------------------------------------------------------------------------
# Kernels
# ----------------------------------------------------------------------------

def _linear_head_tiled_kernel(x_ref, w_ref, b_ref, o_ref, acc_ref):
    # x_ref: (tm, tk) compute dtype, w_ref: (tk, tn) compute dtype,
    # b_ref: (1, tn) f32, o_ref: (tm, tn) out dtype, acc_ref: (tm, tn) f32.
    k = pl.program_id(2)

    @pl.when(k == 0)
    def _zero_acc():
        acc_ref[...] = jnp.zeros_like(acc_ref)

    acc_ref[...] += jnp.dot(
        x_ref[...], w_ref[...], preferred_element_type=jnp.float32
    )

    @pl.when(k == pl.num_programs(2) - 1)
    def _epilogue():
        # Bias added once in f32, single cast on the way out.
        o_ref[...] = (acc_ref[...] + b_ref[...]).astype(o_ref.dtype)


def _linear_head_small_kernel(x_ref, w_ref, b_ref, o_ref):
    # Whole problem in VMEM: single MXU call, bias add, cast.
    o_ref[...] = (
        jnp.dot(x_ref[...], w_ref[...], preferred_element_type=jnp.float32)
        + b_ref[...]
    ).astype(o_ref.dtype)


# ----------------------------------------------------------------------------
# Parameter preparation (one-time, hoisted out of the per-call hot path)
# ----------------------------------------------------------------------------

class PreparedHead(NamedTuple):
    w: jax.Array          # (Kp, Np) compute dtype, transposed + zero-padded
    b: jax.Array          # (1, Np) float32, zero-padded
    in_dim: int
    out_dim: int
    tk: int
    tn: int
    tm_cap: int
    vmem_limit: int
    compute_dtype: Any


def prepare_linear_head(weight, bias, *, compute_dtype=jnp.bfloat16,
                        max_batch=_TM_CAP, vmem_cap=None):
    """One-time prep of nn.Linear parameters for the Pallas head.

    weight: (out_dim, in_dim)  -- PyTorch nn.Linear layout.
    bias:   (out_dim,)
    """
    out_dim, in_dim = weight.shape
    assert bias.shape == (out_dim,)
    if vmem_cap is None:
        vmem_cap = _vmem_capacity_bytes()

    in_itemsize = jnp.dtype(compute_dtype).itemsize
    tm_cap, tk, tn, vmem_limit = _select_tiles(
        in_dim, out_dim,
        in_itemsize=in_itemsize,
        out_itemsize=4,                       # worst case: f32 outputs
        vmem_cap=vmem_cap,
        tm=min(_round_up(max_batch, 16), _TM_CAP),
    )

    kp = _round_up(in_dim, tk)
    np_ = _round_up(out_dim, tn)

    w = weight.T.astype(compute_dtype)        # (in_dim, out_dim), cast once
    if (kp, np_) != (in_dim, out_dim):
        w = jnp.pad(w, ((0, kp - in_dim), (0, np_ - out_dim)))
    b = bias.astype(jnp.float32).reshape(1, out_dim)
    if np_ != out_dim:
        b = jnp.pad(b, ((0, 0), (0, np_ - out_dim)))

    return PreparedHead(w=w, b=b, in_dim=in_dim, out_dim=out_dim,
                        tk=tk, tn=tn, tm_cap=tm_cap,
                        vmem_limit=vmem_limit, compute_dtype=compute_dtype)


# ----------------------------------------------------------------------------
# Forward (hot path)
# ----------------------------------------------------------------------------

def linear_classification_head(embeddings, prepared: PreparedHead):
    """Forward of LinearClassificationHead: embeddings @ W^T + b.

    embeddings: (..., in_dim).  Returns (..., out_dim) in embeddings.dtype.
    """
    orig_shape = embeddings.shape
    if embeddings.ndim != 2:
        embeddings = embeddings.reshape(-1, orig_shape[-1])
    batch, in_dim = embeddings.shape
    assert in_dim == prepared.in_dim
    out_dtype = embeddings.dtype
    kp, np_ = prepared.w.shape

    x = embeddings.astype(prepared.compute_dtype)

    # ---- tiny fast path: single no-grid call, whole problem in VMEM --------
    if batch * kp + kp * np_ + batch * np_ <= _FAST_PATH_MAX_ELEMS:
        if kp != in_dim:
            x = jnp.pad(x, ((0, 0), (0, kp - in_dim)))
        out = pl.pallas_call(
            _linear_head_small_kernel,
            out_shape=jax.ShapeDtypeStruct((batch, np_), out_dtype),
        )(x, prepared.w, prepared.b)
        if np_ != prepared.out_dim:
            out = out[:, :prepared.out_dim]
        if len(orig_shape) != 2:
            out = out.reshape(*orig_shape[:-1], prepared.out_dim)
        return out

    # ---- tiled path ---------------------------------------------------------
    tm = _pick_tm(batch, prepared.tm_cap)
    tk, tn = prepared.tk, prepared.tn
    mp = _round_up(batch, tm)
    if (mp, kp) != (batch, in_dim):
        x = jnp.pad(x, ((0, mp - batch), (0, kp - in_dim)))

    grid = (mp // tm, np_ // tn, kp // tk)

    out_padded = pl.pallas_call(
        _linear_head_tiled_kernel,
        out_shape=jax.ShapeDtypeStruct((mp, np_), out_dtype),
        grid_spec=pltpu.PrefetchScalarGridSpec(
            num_scalar_prefetch=0,
            grid=grid,
            in_specs=[
                pl.BlockSpec((tm, tk), lambda i, j, k: (i, k)),
                pl.BlockSpec((tk, tn), lambda i, j, k: (k, j)),
                pl.BlockSpec((1, tn), lambda i, j, k: (0, j)),
            ],
            out_specs=pl.BlockSpec((tm, tn), lambda i, j, k: (i, j)),
            scratch_shapes=[pltpu.VMEM((tm, tn), jnp.float32)],
        ),
        compiler_params=pltpu.CompilerParams(
            dimension_semantics=("parallel", "parallel", "arbitrary"),
            vmem_limit_bytes=prepared.vmem_limit,
        ),
    )(x, prepared.w, prepared.b)

    if (mp, np_) != (batch, prepared.out_dim):
        out_padded = out_padded[:batch, :prepared.out_dim]
    if len(orig_shape) != 2:
        out_padded = out_padded.reshape(*orig_shape[:-1], prepared.out_dim)
    return out_padded


# ----------------------------------------------------------------------------
# Demo / correctness check
# ----------------------------------------------------------------------------

if __name__ == "__main__":
    key = jax.random.PRNGKey(0)

    # --- Small shape matching the module default (fast path): B=8, 32 -> 16.
    B, in_dim, out_dim = 8, 32, 16
    kx, kw, kb = jax.random.split(key, 3)
    bound = 1.0 / jnp.sqrt(jnp.float32(in_dim))
    embeddings = jax.random.normal(kx, (B, in_dim), dtype=jnp.float32)
    # PyTorch nn.Linear layout: weight (out_dim, in_dim), bias (out_dim,).
    weight = jax.random.uniform(kw, (out_dim, in_dim), jnp.float32, -bound, bound)
    bias = jax.random.uniform(kb, (out_dim,), jnp.float32, -bound, bound)

    prepared = prepare_linear_head(weight, bias)            # one-time prep
    out = linear_classification_head(embeddings, prepared)  # hot path
    out = jax.block_until_ready(out)
    assert out.shape == (B, out_dim)

    # Reference with the same bf16 input quantization + f32 accumulation.
    x_q = embeddings.astype(jnp.bfloat16).astype(jnp.float32)
    w_q = weight.T.astype(jnp.bfloat16).astype(jnp.float32)
    ref_q = jnp.dot(x_q, w_q, precision="highest") + bias[None, :]
    assert jnp.allclose(out, ref_q, atol=1e-3, rtol=1e-3)

    # Sanity check against full-f32 nn.Linear math (loose: bf16 inputs).
    ref_f32 = jnp.dot(embeddings, weight.T, precision="highest") + bias[None, :]
    assert jnp.allclose(out, ref_f32, atol=5e-2, rtol=5e-2)

    # --- Exercise the tiled (gridded) path with non-aligned dims.
    B2, in2, out2 = 48, 640, 4100
    k1, k2, k3 = jax.random.split(jax.random.PRNGKey(1), 3)
    x2 = jax.random.normal(k1, (B2, in2), dtype=jnp.float32)
    bnd2 = 1.0 / jnp.sqrt(jnp.float32(in2))
    w2 = jax.random.uniform(k2, (out2, in2), jnp.float32, -bnd2, bnd2)
    b2 = jax.random.uniform(k3, (out2,), jnp.float32, -bnd2, bnd2)

    prepared2 = prepare_linear_head(w2, b2)
    out2_arr = jax.block_until_ready(linear_classification_head(x2, prepared2))
    assert out2_arr.shape == (B2, out2)

    x2_q = x2.astype(jnp.bfloat16).astype(jnp.float32)
    w2_q = w2.T.astype(jnp.bfloat16).astype(jnp.float32)
    ref2 = jnp.dot(x2_q, w2_q, precision="highest") + b2[None, :]
    assert jnp.allclose(out2_arr, ref2, atol=1e-2, rtol=1e-2)

    print("KERNEL_OK")
</pallas_src>

<mosaic_0001>
module attributes {stable_mosaic.version = 11 : i64} {
  func.func @_linear_head_small_kernel(%arg0: memref<8x128xbf16, #tpu.memory_space<vmem>>, %arg1: memref<128x128xbf16, #tpu.memory_space<vmem>>, %arg2: memref<1x128xf32, #tpu.memory_space<vmem>>, %arg3: memref<8x128xf32, #tpu.memory_space<vmem>>) attributes {dimension_semantics = [], scalar_prefetch = 0 : i64, scratch_operands = 0 : i64, tpu.core_type = #tpu.core_type<tc>} {
    %c0 = arith.constant 0 : index
    %c0_0 = arith.constant 0 : index
    %0 = vector.load %arg0[%c0, %c0_0] : memref<8x128xbf16, #tpu.memory_space<vmem>>, vector<8x128xbf16>
    %c0_1 = arith.constant 0 : index
    %c0_2 = arith.constant 0 : index
    %1 = vector.load %arg1[%c0_1, %c0_2] : memref<128x128xbf16, #tpu.memory_space<vmem>>, vector<128x128xbf16>
    %cst = arith.constant dense<0.000000e+00> : vector<8x128xf32>
    %2 = tpu.matmul %0, %1, %cst {dimension_numbers = #tpu.dot_dimension_numbers<[1], [0], [0], [1], [0, 0, 1, 1], [], []>} : vector<8x128xbf16>, vector<128x128xbf16>, vector<8x128xf32> -> vector<8x128xf32>
    %c0_3 = arith.constant 0 : index
    %c0_4 = arith.constant 0 : index
    %3 = vector.load %arg2[%c0_3, %c0_4] : memref<1x128xf32, #tpu.memory_space<vmem>>, vector<1x128xf32>
    %4 = vector.broadcast %3 : vector<1x128xf32> to vector<8x128xf32>
    %5 = arith.addf %2, %4 : vector<8x128xf32>
    %c0_5 = arith.constant 0 : index
    %c0_6 = arith.constant 0 : index
    %6 = vector.load %arg3[%c0_5, %c0_6] : memref<8x128xf32, #tpu.memory_space<vmem>>, vector<8x128xf32>
    tpu.vector_store %arg3[%c0_5, %c0_6], %5 {strides = array<i32>} : memref<8x128xf32, #tpu.memory_space<vmem>>, vector<8x128xf32>,
    return
  }
}

</mosaic_0001>

<bundles_post_ra>
// kernel: tpu_custom_call.1
= control target key start
LH: loop header
LB: loop body
LE: loop exit
PB: predicated region body
PF: predicated region fallthrough
CT: control target
= control target key end

     0   :  { %8 = vsyncpa [#allocation3], 0  ;;  %s307_s0 = inlined_call_operand.hbm [shape: bf16[8,128], index: 0, kind: input, shape index: {}]   ;;  %s308_s1 = inlined_call_operand.hbm [shape: bf16[128,128], index: 1, kind: input, shape index: {}]   ;;  %s309_s2 = inlined_call_operand.vmem [shape: f32[1,128], index: 2, kind: input, shape index: {}]   ;;  %s310_s3 = inlined_call_operand.hbm [shape: f32[8,128], index: 3, kind: output, shape index: {}]  }
   0x1   :  { %9 = vsyncpa [#allocation6], 0 }
   0x2   :  { %10 = vsyncpa [#allocation4], 0  ;;  %s16_s14 = sshll.u32 %s307_s0, 4  ;;  %s270_s15 = smov [#allocation2]   ;;  %s17_s14 = int_to_ptr.hbm [resolvable:$true] %s16_s14 }
   0x3   :  { %s18_s16 = sshll.u32 %s270_s15, 4  ;;  %s26_s19 = sshll.u32 %s308_s1, 4  ;;  %s19_s16 = int_to_ptr.vmem [resolvable:$true] %s18_s16  ;;  %s27_s19 = int_to_ptr.hbm [resolvable:$true] %s26_s19 }
   0x4   :  { %21 = dma.hbm_to_vmem [thread:$0]  %s17_s14, 64, %s19_s16, [#allocation3]  }
   0x5   :  { %s271_s20 = smov [#allocation5]   ;;  %s272_s22 = smov 64  }
   0x6   :  { %s28_s21 = sshll.u32 %s271_s20, 4  ;;  %s273_s23 = smov 4   ;;  %s29_s21 = int_to_ptr.vmem [resolvable:$true] %s28_s21 }
   0x7   :  { %34 = dma.hbm_to_vmem [thread:$0]  %s27_s19, 1024, %s29_s21, [#allocation6], %s272_s22, %s272_s22, %s273_s23  }
   0x8   :  { %264 = dma.done.wait [#allocation3], 64  }
   0x9   :  { %265 = vsyncadd [#allocation3], 4294967232 }
   0xa   :  { %266 = dma.done.wait [#allocation6], 1024  }
   0xb   :  { %267 = vsyncadd [#allocation6], 4294966272  ;;  %v185_v0 = vld [vmem:[#allocation5 + $0x38] sm:$0xff]  ;;  %v184_v1 = vld [vmem:[#allocation5 + $0x30] sm:$0xff]  ;;  %s274_s24 = smov [#allocation7]   ;;  %s135_s28 = sshll.u32 %s310_s3, 4  ;;  %s136_s28 = int_to_ptr.hbm [resolvable:$true] %s135_s28 }
   0xc   :  { %114 = vmatpush.bf16.msra.mxu0 %v185_v0  ;;  %v183_v2 = vld [vmem:[#allocation5 + $0x28] sm:$0xff]  ;;  %v182_v3 = vld [vmem:[#allocation5 + $0x20] sm:$0xff]  ;;  %v181_v4 = vld [vmem:[#allocation5 + $0x18] sm:$0xff]  ;;  %s133_s25 = sshll.u32 %s274_s24, 4  ;;  %s134_s25 = int_to_ptr.vmem [resolvable:$true] %s133_s25 }
   0xd   :  { %v180_v5 = vld [vmem:[#allocation5 + $0x10] sm:$0xff]  ;;  %v179_v6 = vld [vmem:[#allocation5 + $0x8] sm:$0xff]  ;;  %v178_v7 = vld [vmem:[#allocation5] sm:$0xff] }
   0xe   :  { %v45_v8 = vld [vmem:[#allocation2] sm:$0xf] }
   0xf   :  { %v191_v9 = vld [vmem:[%s309_s2] ss:$0 sm:$0xff] }
  0x10   :  { %115 = vmatpush.bf16.msra.mxu0 %v184_v1 }
  0x14   :  { %116 = vmatpush.bf16.msra.mxu0 %v183_v2 }
  0x18   :  { %117 = vmatpush.bf16.msra.mxu0 %v182_v3 }
  0x1c   :  { %118 = vmatpush.bf16.msra.mxu0 %v181_v4 }
  0x20   :  { %119 = vmatpush.bf16.msra.mxu0 %v180_v5 }
  0x24   :  { %120 = vmatpush.bf16.msra.mxu0 %v179_v6 }
  0x28   :  { %121 = vmatpush.bf16.msra.mxu0 %v178_v7 }
  0x2b   :  { %122 = vmatmul.bf16.vlgmr.msra.gmra.mxu0 %v45_v8 }
  0xa8   :  { %v123_v10 = vpop.f32.mrf.mxu0 }
  0xa9   :  { %v124_v11 = vadd.f32 %v191_v9, %v123_v10 }
  0xab   :  { %127 = vst [vmem:[#allocation7] sm:$0xff] %v124_v11 }
  0xac   :  { %138 = dma.vmem_to_hbm [thread:$0]  %s134_s25, 128, %s136_s28, [#allocation4]  }
  0xb0   :  { %v125_v12 = vpop.f32.mrf.mxu0 }
  0xb1   :  { %268 = dma.done.wait [#allocation4], 128  }
  0xb2   :  { %269 = vsyncadd [#allocation4], 4294967168 }
  0xb3   :  { %143 = vsyncpa [#allocation3], 1 }
  0xb4   :  { %144 = vsyncpa [#allocation6], 1 }
  0xb5   :  { %145 = vsyncpa [#allocation4], 1 }

</bundles_post_ra>
